<compile_context>
chip_gen: v5e
topology: v5e:2x2
jax: 0.10.0
libtpu: 0.0.40
codegen_flags: <defaults>
</compile_context>

<pallas_src>
import jax
import jax.numpy as jnp
import numpy as np
from jax.experimental import pallas as pl
from jax.experimental.pallas import tpu as pltpu

EPS = 1e-5


# ---------------------------------------------------------------------------
# Parameter preparation (host-side glue, done once per weight set)
# ---------------------------------------------------------------------------
def _toeplitz_weights(w_hwio, width, dtype):
    """(3,3,Cin,Cout) HWIO conv weights -> (3, W*Cin, W*Cout) block-Toeplitz.

    With activation rows laid out as [w*Cin + ci] on the lane axis,
    `row @ T[ky]` performs the kx part of the 3x3 conv with the W-direction
    zero padding folded into the absent (zero) bands; the ky part becomes
    three row-shifted matmuls inside the kernel.
    """
    w = np.asarray(w_hwio, np.float32)
    _, _, cin, cout = w.shape
    t = np.zeros((3, width * cin, width * cout), np.float32)
    for ky in range(3):
        for kx in range(3):
            for wo in range(width):
                wi = wo + kx - 1
                if 0 <= wi < width:
                    t[ky, wi * cin:(wi + 1) * cin,
                      wo * cout:(wo + 1) * cout] = w[ky, kx]
    return jnp.asarray(t, dtype)


def prepare_params(params, width, *, compute_dtype=jnp.bfloat16):
    """Convert natural conv/BN params into kernel-ready arrays."""
    cout = params["b1"].shape[0]
    f32 = jnp.float32
    return {
        "t1": _toeplitz_weights(params["w1"], width, compute_dtype),  # (3,W*Cin, W*Cout)
        "t2": _toeplitz_weights(params["w2"], width, compute_dtype),  # (3,W*Cout,W*Cout)
        "b1_row": jnp.tile(params["b1"], width).reshape(1, width * cout).astype(f32),
        "b2_row": jnp.tile(params["b2"], width).reshape(1, width * cout).astype(f32),
        "g1": params["g1"], "beta1": params["beta1"],
        "g2": params["g2"], "beta2": params["beta2"],
        "cout": cout, "width": width, "compute_dtype": compute_dtype,
    }


# ---------------------------------------------------------------------------
# Block-size heuristics
# ---------------------------------------------------------------------------
def _pick_imgs_per_block(n_imgs, img_h, row_bytes):
    """Largest #images per conv-pass block: target ~512 rows (near HBM
    roofline per measured tiling data), a conservative per-step VMEM budget,
    and >= 2 grid steps so v7x's second TensorCore has work.
    TODO(synk): derive the VMEM budget from pltpu.get_tpu_info()
    (64 MiB physical on v7x vs 128 MiB on v5e/v6e)."""
    target_rows = 512
    vmem_budget = 8 << 20          # ~6x (in+out blocks, double-buffered) headroom
    best = 1
    for d in range(1, n_imgs + 1):
        if n_imgs % d:
            continue
        rows = d * img_h
        if rows > max(target_rows, img_h) or rows * row_bytes * 6 > vmem_budget:
            break
        if n_imgs // d >= 2 or n_imgs == 1:
            best = d
    return best


def _pick_row_block(total_rows, *, cap=2048, mult=8):
    """Largest row block that divides total_rows, is a multiple of `mult`,
    is <= cap, and leaves >= 2 grid steps (megacore). Fallback: one block."""
    best = None
    for d in range(1, total_rows + 1):
        if total_rows % d or d % mult or d > cap:
            continue
        if total_rows // d >= 2:
            best = d
    return best if best is not None else total_rows


# ---------------------------------------------------------------------------
# Conv pass: 3x3 conv (+bias), optional fused BN+ReLU of the INPUT, and
# per-block BatchNorm partial statistics of the raw (f32) OUTPUT.
# ---------------------------------------------------------------------------
def _make_conv_kernel(rb, img_h, compute_dtype, normalize_input):
    ipb = rb // img_h            # whole images per block

    def kernel(*refs):
        if normalize_input:
            x_ref, t_ref, brow_ref, scale_ref, shift_ref, y_ref, stats_ref = refs
        else:
            x_ref, t_ref, brow_ref, y_ref, stats_ref = refs

        h = x_ref[...]
        if normalize_input:
            # fused BatchNorm(+affine)+ReLU of the previous conv's raw output,
            # elementwise math in f32 (v5e has no bf16 VPU path)
            h = jnp.maximum(h.astype(jnp.float32) * scale_ref[...]
                            + shift_ref[...], 0.0)
        h = h.astype(compute_dtype)                       # matmul operand dtype

        wc_in = h.shape[-1]
        zrow = jnp.zeros((1, wc_in), compute_dtype)
        # row-above / row-below operands; the inserted zero rows ARE the conv's
        # top/bottom zero padding because every block starts/ends at image
        # boundaries (row_block is a multiple of H) -> no halo DMAs needed.
        h_up = jnp.concatenate([zrow, h[:-1, :]], axis=0)   # h_up[i] = h[i-1]
        h_dn = jnp.concatenate([h[1:, :], zrow], axis=0)    # h_dn[i] = h[i+1]
        if ipb > 1:
            # zero contributions that would cross an interior image seam
            r = jax.lax.broadcasted_iota(jnp.int32, (rb, 1), 0) % img_h
            h_up = jnp.where(r != 0, h_up, 0).astype(compute_dtype)
            h_dn = jnp.where(r != img_h - 1, h_dn, 0).astype(compute_dtype)

        # 3x3 conv = three row-shifted matmuls against block-Toeplitz weights.
        # K = W*Cin, lane dim = W*Cout; f32 MXU accumulation (MRB accumulates
        # in place on v7x, so the three results cost little extra pop traffic).
        acc = jnp.dot(h_up, t_ref[0], preferred_element_type=jnp.float32)
        acc = acc + jnp.dot(h, t_ref[1], preferred_element_type=jnp.float32)
        acc = acc + jnp.dot(h_dn, t_ref[2], preferred_element_type=jnp.float32)
        acc = acc + brow_ref[...]

        y_ref[...] = acc.astype(y_ref.dtype)              # bf16 store in prod path

        # per-lane partial sums for two-pass BatchNorm, taken from the f32 acc
        wc_out = acc.shape[-1]
        s = jnp.sum(acc, axis=0, keepdims=True)
        q = jnp.sum(acc * acc, axis=0, keepdims=True)
        stats_ref[...] = jnp.concatenate([s, q], axis=0).reshape(1, 2, wc_out)

    return kernel


def _conv_pass(x_rows, t_w, b_row, scale_row=None, shift_row=None,
               *, img_h, imgs_per_block, out_dtype, compute_dtype):
    total_rows, wc_in = x_rows.shape
    wc_out = t_w.shape[-1]
    rb = imgs_per_block * img_h
    assert total_rows % rb == 0
    n_blocks = total_rows // rb
    normalize_input = scale_row is not None

    kernel = _make_conv_kernel(rb, img_h, compute_dtype, normalize_input)

    in_specs = [
        pl.BlockSpec((rb, wc_in), lambda j: (j, 0)),            # pipelined rows
        pl.BlockSpec((3, wc_in, wc_out), lambda j: (0, 0, 0)),  # resident weights
        pl.BlockSpec((1, wc_out), lambda j: (0, 0)),            # bias row
    ]
    args = [x_rows, t_w, b_row]
    if normalize_input:
        in_specs += [pl.BlockSpec((1, wc_in), lambda j: (0, 0))] * 2
        args += [scale_row, shift_row]

    y, stats = pl.pallas_call(
        kernel,
        out_shape=(jax.ShapeDtypeStruct((total_rows, wc_out), out_dtype),
                   jax.ShapeDtypeStruct((n_blocks, 2, wc_out), jnp.float32)),
        grid_spec=pltpu.PrefetchScalarGridSpec(
            num_scalar_prefetch=0,
            grid=(n_blocks,),
            in_specs=in_specs,
            out_specs=(pl.BlockSpec((rb, wc_out), lambda j: (j, 0)),
                       pl.BlockSpec((1, 2, wc_out), lambda j: (j, 0, 0)))),
        compiler_params=pltpu.CompilerParams(
            dimension_semantics=("parallel",)),
    )(*args)
    return y, stats


# ---------------------------------------------------------------------------
# BatchNorm glue: fold per-block partial sums into per-lane scale/shift rows.
# (Full N*H*W reduction -> matches training-mode batch statistics exactly.)
# ---------------------------------------------------------------------------
def _bn_affine_rows(stats, gamma, beta, width, cout, count):
    tot = jnp.sum(stats, axis=0)                              # (2, W*Cout)
    s = jnp.sum(tot[0].reshape(width, cout), axis=0)          # (Cout,)
    q = jnp.sum(tot[1].reshape(width, cout), axis=0)
    mean = s / count
    var = q / count - mean * mean                             # biased (train mode)
    scale = gamma * jax.lax.rsqrt(var + EPS)
    shift = beta - mean * scale
    return (jnp.tile(scale, width).reshape(1, width * cout).astype(jnp.float32),
            jnp.tile(shift, width).reshape(1, width * cout).astype(jnp.float32))


# ---------------------------------------------------------------------------
# Epilogue: BN2 + ReLU + residual add of BN1+ReLU(y1)  (pure streaming).
# ---------------------------------------------------------------------------
def _epilogue_kernel(y2_ref, y1_ref, s2_ref, t2_ref, s1_ref, t1_ref, o_ref):
    a2 = jnp.maximum(y2_ref[...].astype(jnp.float32) * s2_ref[...] + t2_ref[...], 0.0)
    a1 = jnp.maximum(y1_ref[...].astype(jnp.float32) * s1_ref[...] + t1_ref[...], 0.0)
    # relu(a2 + a1) == a2 + a1 since both operands are >= 0: the module's
    # outer ReLU is a provable no-op and is dropped.
    o_ref[...] = (a2 + a1).astype(o_ref.dtype)


def _epilogue(y2, y1, s2, t2, s1, t1, *, row_block, out_dtype):
    total_rows, wc = y2.shape
    n_blocks = total_rows // row_block
    row_spec = pl.BlockSpec((row_block, wc), lambda j: (j, 0))
    vec_spec = pl.BlockSpec((1, wc), lambda j: (0, 0))
    # TODO(synk): alias y2 to the output via input_output_aliases when the
    # output dtype matches y2's storage dtype (f32 parity mode).
    return pl.pallas_call(
        _epilogue_kernel,
        out_shape=jax.ShapeDtypeStruct((total_rows, wc), out_dtype),
        grid_spec=pltpu.PrefetchScalarGridSpec(
            num_scalar_prefetch=0,
            grid=(n_blocks,),
            in_specs=[row_spec, row_spec, vec_spec, vec_spec, vec_spec, vec_spec],
            out_specs=row_spec),
        compiler_params=pltpu.CompilerParams(
            dimension_semantics=("parallel",)),
    )(y2, y1, s2, t2, s1, t1)


# ---------------------------------------------------------------------------
# Forward pass
# ---------------------------------------------------------------------------
def double_conv(x_nchw, kparams, *, imgs_per_block=None):
    """DoubleConv forward.  x: (N, Cin, H, W) -> (N, Cout, H, W) float32."""
    n, cin, h, w = x_nchw.shape
    cout = kparams["cout"]
    cdt = kparams["compute_dtype"]
    assert kparams["width"] == w, "params were prepared for a different width"

    if imgs_per_block is None:
        row_bytes = max(w * cin, w * cout) * 4
        imgs_per_block = _pick_imgs_per_block(n, h, row_bytes)

    # NCHW -> (N*H, W*Cin): one image row per matrix row, W*C on the lane axis.
    x_rows = jnp.transpose(x_nchw, (0, 2, 3, 1)).reshape(n * h, w * cin)
    x_rows = x_rows.astype(jnp.float32)
    count = n * h * w

    # pass 1: conv1 (+bias) -> raw y1 (stored in compute dtype) + BN partials
    y1, st1 = _conv_pass(x_rows, kparams["t1"], kparams["b1_row"],
                         img_h=h, imgs_per_block=imgs_per_block,
                         out_dtype=cdt, compute_dtype=cdt)
    sc1, sh1 = _bn_affine_rows(st1, kparams["g1"], kparams["beta1"], w, cout, count)

    # pass 2: BN1+ReLU fused on the fly -> conv2 (+bias) -> raw y2 + BN partials
    y2, st2 = _conv_pass(y1, kparams["t2"], kparams["b2_row"], sc1, sh1,
                         img_h=h, imgs_per_block=imgs_per_block,
                         out_dtype=cdt, compute_dtype=cdt)
    sc2, sh2 = _bn_affine_rows(st2, kparams["g2"], kparams["beta2"], w, cout, count)

    # pass 3: BN2+ReLU + residual (recomputes a1 from y1 -> a1 never hits HBM)
    mult = 16 if cdt == jnp.bfloat16 else 8
    ep_rb = _pick_row_block(n * h, cap=2048, mult=mult)
    out_rows = _epilogue(y2, y1, sc2, sh2, sc1, sh1,
                         row_block=ep_rb, out_dtype=jnp.float32)

    out = out_rows.reshape(n, h, w, cout)
    return jnp.transpose(out, (0, 3, 1, 2))


# ---------------------------------------------------------------------------
# Params / reference / test
# ---------------------------------------------------------------------------
def init_params(key, in_ch, out_ch):
    ks = jax.random.split(key, 8)
    return {
        "w1": jax.random.normal(ks[0], (3, 3, in_ch, out_ch), jnp.float32) * 0.2,
        "b1": jax.random.normal(ks[1], (out_ch,), jnp.float32) * 0.1,
        "g1": 1.0 + 0.1 * jax.random.normal(ks[2], (out_ch,), jnp.float32),
        "beta1": 0.1 * jax.random.normal(ks[3], (out_ch,), jnp.float32),
        "w2": jax.random.normal(ks[4], (3, 3, out_ch, out_ch), jnp.float32) * 0.2,
        "b2": jax.random.normal(ks[5], (out_ch,), jnp.float32) * 0.1,
        "g2": 1.0 + 0.1 * jax.random.normal(ks[6], (out_ch,), jnp.float32),
        "beta2": 0.1 * jax.random.normal(ks[7], (out_ch,), jnp.float32),
    }


def _reference_forward(x_nchw, p):
    """Pure-JAX f32 reference (lax conv + training-mode batchnorm)."""
    x = jnp.transpose(x_nchw, (0, 2, 3, 1)).astype(jnp.float32)

    def conv(hh, w_hwio, b):
        y = jax.lax.conv_general_dilated(
            hh, w_hwio, window_strides=(1, 1), padding="SAME",
            dimension_numbers=("NHWC", "HWIO", "NHWC"))
        return y + b.reshape(1, 1, 1, -1)

    def bn(y, g, beta):
        m = jnp.mean(y, axis=(0, 1, 2), keepdims=True)
        v = jnp.mean((y - m) ** 2, axis=(0, 1, 2), keepdims=True)
        return ((y - m) * jax.lax.rsqrt(v + EPS) * g.reshape(1, 1, 1, -1)
                + beta.reshape(1, 1, 1, -1))

    a1 = jax.nn.relu(bn(conv(x, p["w1"], p["b1"]), p["g1"], p["beta1"]))
    y2 = jax.nn.relu(bn(conv(a1, p["w2"], p["b2"]), p["g2"], p["beta2"]))
    out = jax.nn.relu(y2 + a1)
    return jnp.transpose(out, (0, 3, 1, 2))


if __name__ == "__main__":
    key = jax.random.PRNGKey(0)
    kx, kp = jax.random.split(key)

    N, CIN, COUT, H, W = 2, 4, 8, 16, 16
    x = jax.random.normal(kx, (N, CIN, H, W), jnp.float32)
    params = init_params(kp, CIN, COUT)
    ref = jax.block_until_ready(_reference_forward(x, params))

    # --- exact-parity path: f32 matmul operands + f32 intermediates ---------
    kp_f32 = prepare_params(params, W, compute_dtype=jnp.float32)
    out_f32 = jax.block_until_ready(double_conv(x, kp_f32))
    assert out_f32.shape == (N, COUT, H, W), out_f32.shape
    err_f32 = float(jnp.max(jnp.abs(out_f32 - ref)))
    assert jnp.allclose(out_f32, ref, rtol=1e-3, atol=1e-3), err_f32

    # --- production path: bf16 matmul operands + bf16 HBM intermediates -----
    kp_bf16 = prepare_params(params, W, compute_dtype=jnp.bfloat16)
    out_bf16 = jax.block_until_ready(double_conv(x, kp_bf16))
    assert out_bf16.shape == (N, COUT, H, W), out_bf16.shape
    err_bf16 = float(jnp.max(jnp.abs(out_bf16 - ref)))
    assert jnp.allclose(out_bf16, ref, rtol=5e-2, atol=8e-2), err_bf16

    print("KERNEL_OK")
</pallas_src>

<mosaic_0001>
module attributes {stable_mosaic.version = 11 : i64} {
  func.func @kernel(%arg0: i32, %arg1: memref<16x64xf32, #tpu.memory_space<vmem>>, %arg2: memref<3x64x128xf32, #tpu.memory_space<vmem>>, %arg3: memref<1x128xf32, #tpu.memory_space<vmem>>, %arg4: memref<16x128xf32, #tpu.memory_space<vmem>>, %arg5: memref<1x2x128xf32, #tpu.memory_space<vmem>>) attributes {dimension_semantics = [#tpu.dimension_semantics<parallel>], iteration_bounds = array<i64: 2>, scalar_prefetch = 0 : i64, scratch_operands = 0 : i64, tpu.core_type = #tpu.core_type<tc>, window_params = [{transform_indices = @transform_0, window_bounds = array<i64: 16, 64>}, {pipeline_mode = #tpu.pipeline_mode<synchronous>, transform_indices = @transform_1, window_bounds = array<i64: 3, 64, 128>}, {pipeline_mode = #tpu.pipeline_mode<synchronous>, transform_indices = @transform_2, window_bounds = array<i64: 1, 128>}, {transform_indices = @transform_3, window_bounds = array<i64: 16, 128>}, {transform_indices = @transform_4, window_bounds = array<i64: 1, 2, 128>}]} {
    %c0 = arith.constant 0 : index
    %c0_0 = arith.constant 0 : index
    %0 = vector.load %arg1[%c0, %c0_0] : memref<16x64xf32, #tpu.memory_space<vmem>>, vector<16x64xf32>
    %cst = arith.constant 0.000000e+00 : f32
    %1 = vector.broadcast %cst : f32 to vector<1x64xf32>
    %2 = vector.extract_strided_slice %0 {offsets = [0, 0], sizes = [15, 64], strides = [1, 1]} : vector<16x64xf32> to vector<15x64xf32>
    %3 = tpu.concatenate %1, %2 in 0 : vector<1x64xf32>, vector<15x64xf32> -> vector<16x64xf32>
    %4 = vector.extract_strided_slice %0 {offsets = [1, 0], sizes = [15, 64], strides = [1, 1]} : vector<16x64xf32> to vector<15x64xf32>
    %5 = tpu.concatenate %4, %1 in 0 : vector<15x64xf32>, vector<1x64xf32> -> vector<16x64xf32>
    %c0_1 = arith.constant 0 : index
    %c0_2 = arith.constant 0 : index
    %c0_3 = arith.constant 0 : index
    %6 = vector.load %arg2[%c0_1, %c0_2, %c0_3] : memref<3x64x128xf32, #tpu.memory_space<vmem>>, vector<1x64x128xf32>
    %7 = vector.shape_cast %6 : vector<1x64x128xf32> to vector<64x128xf32>
    %cst_4 = arith.constant dense<0.000000e+00> : vector<16x128xf32>
    %8 = tpu.matmul %3, %7, %cst_4 {dimension_numbers = #tpu.dot_dimension_numbers<[1], [0], [0], [1], [0, 0, 1, 1], [], []>} : vector<16x64xf32>, vector<64x128xf32>, vector<16x128xf32> -> vector<16x128xf32>
    %c1 = arith.constant 1 : index
    %c0_5 = arith.constant 0 : index
    %c0_6 = arith.constant 0 : index
    %9 = vector.load %arg2[%c1, %c0_5, %c0_6] : memref<3x64x128xf32, #tpu.memory_space<vmem>>, vector<1x64x128xf32>
    %10 = vector.shape_cast %9 : vector<1x64x128xf32> to vector<64x128xf32>
    %cst_7 = arith.constant dense<0.000000e+00> : vector<16x128xf32>
    %11 = tpu.matmul %0, %10, %cst_7 {dimension_numbers = #tpu.dot_dimension_numbers<[1], [0], [0], [1], [0, 0, 1, 1], [], []>} : vector<16x64xf32>, vector<64x128xf32>, vector<16x128xf32> -> vector<16x128xf32>
    %12 = arith.addf %8, %11 : vector<16x128xf32>
    %c2 = arith.constant 2 : index
    %c0_8 = arith.constant 0 : index
    %c0_9 = arith.constant 0 : index
    %13 = vector.load %arg2[%c2, %c0_8, %c0_9] : memref<3x64x128xf32, #tpu.memory_space<vmem>>, vector<1x64x128xf32>
    %14 = vector.shape_cast %13 : vector<1x64x128xf32> to vector<64x128xf32>
    %cst_10 = arith.constant dense<0.000000e+00> : vector<16x128xf32>
    %15 = tpu.matmul %5, %14, %cst_10 {dimension_numbers = #tpu.dot_dimension_numbers<[1], [0], [0], [1], [0, 0, 1, 1], [], []>} : vector<16x64xf32>, vector<64x128xf32>, vector<16x128xf32> -> vector<16x128xf32>
    %16 = arith.addf %12, %15 : vector<16x128xf32>
    %c0_11 = arith.constant 0 : index
    %c0_12 = arith.constant 0 : index
    %17 = vector.load %arg3[%c0_11, %c0_12] : memref<1x128xf32, #tpu.memory_space<vmem>>, vector<1x128xf32>
    %18 = vector.broadcast %17 : vector<1x128xf32> to vector<16x128xf32>
    %19 = arith.addf %16, %18 : vector<16x128xf32>
    %c0_13 = arith.constant 0 : index
    %c0_14 = arith.constant 0 : index
    %20 = vector.load %arg4[%c0_13, %c0_14] : memref<16x128xf32, #tpu.memory_space<vmem>>, vector<16x128xf32>
    tpu.vector_store %arg4[%c0_13, %c0_14], %19 {strides = array<i32>} : memref<16x128xf32, #tpu.memory_space<vmem>>, vector<16x128xf32>,
    %cst_15 = arith.constant dense<0.000000e+00> : vector<128xf32>
    %21 = vector.multi_reduction <add>, %19, %cst_15 [0] : vector<16x128xf32> to vector<128xf32>
    %22 = vector.shape_cast %21 : vector<128xf32> to vector<1x128xf32>
    %23 = arith.mulf %19, %19 : vector<16x128xf32>
    %cst_16 = arith.constant dense<0.000000e+00> : vector<128xf32>
    %24 = vector.multi_reduction <add>, %23, %cst_16 [0] : vector<16x128xf32> to vector<128xf32>
    %25 = vector.shape_cast %24 : vector<128xf32> to vector<1x128xf32>
    %26 = tpu.concatenate %22, %25 in 0 : vector<1x128xf32>, vector<1x128xf32> -> vector<2x128xf32>
    %27 = vector.shape_cast %26 : vector<2x128xf32> to vector<1x2x128xf32>
    %c0_17 = arith.constant 0 : index
    %c0_18 = arith.constant 0 : index
    %c0_19 = arith.constant 0 : index
    %28 = vector.load %arg5[%c0_17, %c0_18, %c0_19] : memref<1x2x128xf32, #tpu.memory_space<vmem>>, vector<1x2x128xf32>
    tpu.vector_store %arg5[%c0_17, %c0_18, %c0_19], %27 {strides = array<i32>} : memref<1x2x128xf32, #tpu.memory_space<vmem>>, vector<1x2x128xf32>,
    return
  }
  func.func @transform_0(%arg0: i32) -> (i32, i32) {
    %c0_i32 = arith.constant 0 : i32
    %c0_i32_0 = arith.constant 0 : i32
    return %arg0, %c0_i32 : i32, i32
  }
  func.func @transform_1(%arg0: i32) -> (i32, i32, i32) {
    %c0_i32 = arith.constant 0 : i32
    %c0_i32_0 = arith.constant 0 : i32
    %c0_i32_1 = arith.constant 0 : i32
    %c0_i32_2 = arith.constant 0 : i32
    return %c0_i32, %c0_i32_0, %c0_i32_1 : i32, i32, i32
  }
  func.func @transform_2(%arg0: i32) -> (i32, i32) {
    %c0_i32 = arith.constant 0 : i32
    %c0_i32_0 = arith.constant 0 : i32
    %c0_i32_1 = arith.constant 0 : i32
    return %c0_i32, %c0_i32_0 : i32, i32
  }
  func.func @transform_3(%arg0: i32) -> (i32, i32) {
    %c0_i32 = arith.constant 0 : i32
    %c0_i32_0 = arith.constant 0 : i32
    return %arg0, %c0_i32 : i32, i32
  }
  func.func @transform_4(%arg0: i32) -> (i32, i32, i32) {
    %c0_i32 = arith.constant 0 : i32
    %c0_i32_0 = arith.constant 0 : i32
    %c0_i32_1 = arith.constant 0 : i32
    return %arg0, %c0_i32, %c0_i32_0 : i32, i32, i32
  }
}

</mosaic_0001>

<bundles_post_ra>
// kernel: tpu_custom_call.1
= control target key start
LH: loop header
LB: loop body
LE: loop exit
PB: predicated region body
PF: predicated region fallthrough
CT: control target
= control target key end

     0   :  { %10 = vsyncpa [#allocation3], 0  ;;  %s1031_s0 = inlined_call_operand.hbm [shape: f32[32,64], index: 0, kind: input, shape index: {}]   ;;  %s1032_s1 = inlined_call_operand.hbm [shape: f32[3,64,128], index: 1, kind: input, shape index: {}]   ;;  %s1033_s2 = inlined_call_operand.vmem [shape: f32[1,128], index: 2, kind: input, shape index: {}]   ;;  %s1034_s3 = inlined_call_operand.hbm [shape: f32[32,128], index: 3, kind: output, shape index: {0}]   ;;  %s1035_s4 = inlined_call_operand.hbm [shape: f32[2,2,128], index: 4, kind: output, shape index: {1}]  }
   0x1   :  { %12 = vsyncpa [#allocation3 + $0x1], 0 }
   0x2   :  { %13 = vsyncpa [#allocation6], 0 }
   0x3   :  { %14 = vsyncpa [#allocation4], 0 }
   0x4   :  { %16 = vsyncpa [#allocation4 + $0x1], 0 }
   0x5   :  { %17 = vsyncpa [#allocation9], 0 }
   0x6   :  { %19 = vsyncpa [#allocation9 + $0x1], 0  ;;  %s849_s15 = smov 0   ;;  %s851_s16 = smov 0  }
   0x7   :  { %s853_s17 = smov 0   ;;  %s855_s18 = smov 0  }
   0x8 LB: > { %s870_s19 = sadd.s32 4294967295, %s817_s18   ;;  %s553_s20 = sadd.s32 4294967294, %s817_s18   ;;  %s817_s18 = sphi %s855_s18, %s1045_s18   ;;  %s813_s17 = sphi %s853_s17, %s1044_s17   ;;  %s809_s16 = sphi %s851_s16, %s1043_s16   ;;  %s805_s15 = sphi %s849_s15, %s1042_s15  }
   0x9   : > { %p45_p0 = scmp.ne.s32.totalorder %s809_s16, %s805_s15  ;;  %p46_p1 = scmp.eq.s32.totalorder %s870_s19, 0 }
   0xa   : > { %p111_p2 = scmp.eq.s32.totalorder %s870_s19, 1  ;;  %p117_p3 = scmp.eq.s32.totalorder %s553_s20, 1 }
   0xb   : > { %p879_p4 = por %p46_p1, %p45_p0  ;;  %p554_p5 = scmp.ge.s32.totalorder %s817_s18, 1 }
   0xc   : > { %p884_p6 = por %p117_p3, %p45_p0  ;;  %p150_p7 = scmp.lt.s32.totalorder %s817_s18, 3 }
   0xd   : > { %s161_s25 = sshll.u32 %s1032_s1, 4  ;;  %s819_s27 = smov [#allocation5]   ;;  %s162_s25 = int_to_ptr.hbm [resolvable:$true] %s161_s25 }
   0xe   : > { %p892_p8 = pnand %p554_p5, %p150_p7  ;;  %s163_s28 = sshll.u32 %s819_s27, 4  ;;  %s164_s28 = int_to_ptr.vmem [resolvable:$true] %s163_s28 }
   0xf   : > { %s902_s29 = sadd.s32 1, %s817_s18   ;;  %s820_s30 = smov 128  }
  0x10   : > { %p598_p9 = pneg %p892_p8  ;;  %s821_s5 = smov 8  }
  0x11   : > { %s29_s6 = ssub.s32 %s817_s18, %s902_s29  ;;  %s32_s7 = sadd.s32 1, %s813_s17 }
  0x12   : > { %p599_p10 = pnand %p598_p9, %p46_p1  ;;  %p30_p12 = scmp.eq.s32.totalorder %s29_s6, 0 }
  0x13   : > { %p39_p13 = scmp.ne.s32.totalorder %s813_s17, %s809_s16  ;;  %p40_p0 = scmp.eq.s32.totalorder %s817_s18, 0 }
  0x14   : > { %601 = dma.hbm_to_vmem [thread:$0]  (!%p599_p10), %s162_s25, 3072, %s164_s28, [#allocation6], %s820_s30, %s820_s30, %s821_s5  }
  0x15   : > { %s914_s8 = scalar_select %p30_p12, %s813_s17, %s32_s7  }
  0x16   : > { %p918_p3 = por %p111_p2, %p39_p13  ;;  %p614_p5 = scmp.lt.s32.totalorder %s817_s18, 2 }
  0x17   : > { %s180_s10 = sand.u32 1, %s813_s17   ;;  %s578_s11 = sshll.u32 %s817_s18, 4 }
  0x18   : > { %p41_p7 = por %p40_p0, %p39_p13  ;;  %s557_s12 = sshll.u32 %s180_s10, 4 }
  0x19   : > { %s189_s20 = scalar_lea.hbm %s1031_s0, %s578_s11  ;;  %s184_s24 = scalar_lea.vmem [#allocation2], %s557_s12 }
  0x1a   : > { %s190_s23 = sshll.u32 %s189_s20, 4  ;;  %s192_s25 = sshll.u32 %s184_s24, 4  ;;  %s191_s23 = int_to_ptr.hbm [resolvable:$true] %s190_s23  ;;  %s193_s25 = int_to_ptr.vmem [resolvable:$true] %s192_s25 }
  0x1b   : > { %p928_p9 = pnand %p614_p5, %p41_p7  ;;  %s181_s28 = scalar_lea.sflag [#allocation3], %s180_s10 }
  0x1c   : > { %s685_s6 = sshra.s32 %s191_s23, 4  ;;  %s692_s12 = scalar_lea.hbm %s1031_s0, 32  ;;  %s686_s6 = int_to_ptr.hbm [resolvable:$true] %s685_s6 }
  0x1d   : > { %s687_s7 = scalar_lea.hbm %s686_s6, 16  ;;  %p689_p10 = pneg %p928_p9 }
  0x1e   : > { %p688_p2 = scmp.ne.s32.totalorder %s686_s6, %s687_s7  ;;  %p693_p0 = scmp.lt.s32.totalorder %s686_s6, %s1031_s0 }
  0x1f   : > { %p694_p5 = scmp.lt.s32.totalorder %s692_s12, %s687_s7 }
  0x20   : > { %p690_p12 = pnand %p689_p10, %p688_p2 }
  0x21   : > { %p695_p7 = por %p694_p5, %p693_p0 }
  0x22   : > { %p691_p13 = pneg %p690_p12 }
  0x24   : > { %p696_p11 = pnand %p695_p7, %p691_p13 }
  0x26   : > { %699 = shalt.err (!%p696_p11)
}
  0x27   : > { %605 = dma.hbm_to_vmem [thread:$0]  (!%p928_p9), %s191_s23, 256, %s193_s25, %s181_s28, %s820_s30, %s820_s30, %s821_s5  }
  0x28   : > { %204 = sbr.rel (%p892_p8) target bundleno = 228 (0xe4), region = 32  ;;  %s948_s10 = sand.u32 (!%p892_p8), 1, %s809_s16  }
  0x29   : > { %s561_s24 = sshll.u32 (!%p892_p8), %s948_s10, 4  ;;  %s207_s6 = scalar_lea.sflag (!%p892_p8), [#allocation3], %s948_s10 }
  0x2a   : > { %s954_s7 = scalar_lea.vmem (!%p892_p8), [#allocation2], %s561_s24 }
  0x2d   : > { %788 = dma.done.wait (%p879_p4), %s207_s6, 256  }
  0x2e   : > { %790 = vsyncadd (%p879_p4), %s207_s6, 4294967040 }
  0x2f   : > { %792 = dma.done.wait (%p46_p1), [#allocation6], 3072  }
  0x30   : > { %794 = vsyncadd (%p46_p1), [#allocation6], 4294964224  ;;  %v345_v0 = vld [vmem:[#allocation5 + $0xb8] sm:$0xff]  ;;  %v344_v1 = vld [vmem:[#allocation5 + $0xb0] sm:$0xff]  ;;  %vm258_vm0 = vcmask 1046528   ;;  %vm252_vm1 = vcmask 1040384  }
  0x31   : > { %v280_v2 = vld [vmem:[#allocation5 + $0x78] sm:$0xff]  ;;  %359 = vmatpush.msra.mxu2 %v345_v0  ;;  %v279_v4 = vld [vmem:[#allocation5 + $0x70] sm:$0xff]  ;;  %v343_v5 = vld [vmem:[#allocation5 + $0xa8] sm:$0xff]  ;;  %vm281_vm2 = vcmask 523264   ;;  %s579_s30 = sshll.u32 %s870_s19, 4  ;;  %s238_s5 = scalar_lea.vmem [#allocation7], %s561_s24 }
  0x32   : > { %294 = vmatpush.msra.mxu0 %v280_v2  ;;  %v271_v3 = vld [vmem:[#allocation5 + $0x38] sm:$0xff]  ;;  %580 = vmatpush.msra.mxu3 %v280_v2  ;;  %v270_v6 = vld [vmem:[#allocation5 + $0x30] sm:$0xff]  ;;  %v278_v7 = vld [vmem:[#allocation5 + $0x68] sm:$0xff]  ;;  %s419_s27 = scalar_lea.hbm %s1034_s3, %s579_s30  ;;  %s420_s28 = sshll.u32 %s238_s5, 4  ;;  %s421_s28 = int_to_ptr.vmem [resolvable:$true] %s420_s28 }
  0x33   : > { %322 = vmatpush.msra.mxu1 %v271_v3  ;;  %360 = vmatpush.msra.mxu2 %v344_v1  ;;  %v269_v8 = vld [vmem:[#allocation5 + $0x28] sm:$0xff]  ;;  %v342_v9 = vld [vmem:[#allocation5 + $0xa0] sm:$0xff]  ;;  %v341_v12 = vld [vmem:[#allocation5 + $0x98] sm:$0xff]  ;;  %s422_s11 = sshll.u32 %s419_s27, 4  ;;  %s403_s13 = scalar_lea.sflag [#allocation4], %s948_s10  ;;  %s423_s11 = int_to_ptr.hbm [resolvable:$true] %s422_s11 }
  0x34   : > { %295 = vmatpush.msra.mxu0 %v279_v4  ;;  %581 = vmatpush.msra.mxu3 %v279_v4  ;;  %v277_v10 = vld [vmem:[#allocation5 + $0x60] sm:$0xff]  ;;  %v276_v13 = vld [vmem:[#allocation5 + $0x58] sm:$0xff]  ;;  %v340_v17 = vld [vmem:[#allocation5 + $0x90] sm:$0xff]  ;;  %s729_s12 = sshra.s32 %s423_s11, 4  ;;  %s735_s6 = scalar_lea.hbm %s1034_s3, 32  ;;  %s730_s12 = int_to_ptr.hbm [resolvable:$true] %s729_s12 }
  0x35   : > { %323 = vmatpush.msra.mxu1 %v270_v6  ;;  %361 = vmatpush.msra.mxu2 %v343_v5  ;;  %v268_v11 = vld [vmem:[#allocation5 + $0x20] sm:$0xff]  ;;  %v267_v15 = vld [vmem:[#allocation5 + $0x18] sm:$0xff]  ;;  %v275_v18 = vld [vmem:[#allocation5 + $0x50] sm:$0xff]  ;;  %s731_s14 = scalar_lea.hbm %s730_s12, 16  ;;  %p736_p11 = scmp.lt.s32.totalorder %s730_s12, %s1034_s3 }
  0x36   : > { %296 = vmatpush.msra.mxu0 %v278_v7  ;;  %582 = vmatpush.msra.mxu3 %v278_v7  ;;  %v248_v14 = vld [vmem:[%s954_s7] sm:$0xff]  ;;  %v249_v16 = vld [vmem:[%s954_s7 + $0x8] sm:$0xff]  ;;  %p732_p1 = scmp.ne.s32.totalorder %s730_s12, %s731_s14  ;;  %p737_p9 = scmp.lt.s32.totalorder %s735_s6, %s731_s14 }
  0x37   : > { %324 = vmatpush.msra.mxu1 %v269_v8  ;;  %362 = vmatpush.msra.mxu2 %v342_v9  ;;  %v266_v19 = vld [vmem:[#allocation5 + $0x10] sm:$0xff]  ;;  %v259_v20 = vrot.slane %v248_v14, 1  ;;  %v260_v21 = vrot.slane %v249_v16, 1  ;;  %v339_v22 = vld [vmem:[#allocation5 + $0x88] sm:$0xff]  ;;  %v253_v24 = vrot.slane %v248_v14, 7  ;;  %v338_v26 = vld [vmem:[#allocation5 + $0x80] sm:$0xff] }
  0x38   : > { %297 = vmatpush.msra.mxu0 %v277_v10  ;;  %583 = vmatpush.msra.mxu3 %v277_v10  ;;  %v274_v23 = vld [vmem:[#allocation5 + $0x48] sm:$0xff]  ;;  %v273_v27 = vld [vmem:[#allocation5 + $0x40] sm:$0xff]  ;;  %v254_v31 = vrot.slane %v249_v16, 7  ;;  %p733_p4 = pnand %p732_p1, %p918_p3  ;;  %p738_p2 = por %p737_p9, %p736_p11 }
  0x39   : > { %325 = vmatpush.msra.mxu1 %v268_v11  ;;  %363 = vmatpush.msra.mxu2 %v341_v12  ;;  %v265_v25 = vld [vmem:[#allocation5 + $0x8] sm:$0xff]  ;;  %v261_v28 = vsel %vm258_vm0, %v259_v20, %v260_v21  ;;  %v264_v29 = vld [vmem:[#allocation5] sm:$0xff]  ;;  %v257_v30 = vsel %vm252_vm1, 0.0, %v253_v24  ;;  %v263_v32 = vsel %vm258_vm0, %v260_v21, 0.0 }
  0x3a   : > { %298 = vmatpush.msra.mxu0 %v276_v13  ;;  %584 = vmatpush.msra.mxu3 %v276_v13  ;;  %v255_v33 = vsel %vm252_vm1, %v253_v24, %v254_v31  ;;  %v654_v37 = vld [vmem:[%s1033_s2] ss:$0 sm:$0xff]  ;;  %p734_p8 = pneg %p733_p4 }
  0x3b   : > { %326 = vmatpush.msra.mxu1 %v267_v15  ;;  %364 = vmatpush.msra.mxu2 %v340_v17 }
  0x3c   : > { %299 = vmatpush.msra.mxu0 %v275_v18  ;;  %585 = vmatpush.msra.mxu3 %v275_v18  ;;  %p739_p10 = pnand %p738_p2, %p734_p8 }
  0x3d   : > { %327 = vmatpush.msra.mxu1 %v266_v19  ;;  %365 = vmatpush.msra.mxu2 %v339_v22 }
  0x3e   : > { %300 = vmatpush.msra.mxu0 %v274_v23  ;;  %586 = vmatpush.msra.mxu3 %v274_v23 }
  0x3f   : > { %328 = vmatpush.msra.mxu1 %v265_v25  ;;  %366 = vmatpush.msra.mxu2 %v338_v26 }
  0x40   : > { %301 = vmatpush.msra.mxu0 %v273_v27  ;;  %569 = vmatmul.msk.f32.vlgmr.msra.gmra.mxu2 %vm281_vm2, %v261_v28 }
  0x41   : > { %329 = vmatpush.msra.mxu1 %v264_v29  ;;  %565 = vmatmul.msk.f32.vlgmr.msra.gmra.mxu0 %vm281_vm2, %v248_v14 }
  0x42   : > { %567 = vmatmul.msk.f32.vlgmr.msra.gmra.mxu1 %vm281_vm2, %v257_v30  ;;  %587 = vmatpush.msra.mxu3 %v273_v27 }
  0x43   : > { %566 = vmatmul.msk.f32.vlgmr.msra.gmra.mxu3 %vm281_vm2, %v249_v16 }
  0x48   : > { %570 = vmatmul.msk.f32.gmra.mxu2 %vm281_vm2, %v263_v32 }
  0x4a   : > { %568 = vmatmul.msk.f32.gmra.mxu1 %vm281_vm2, %v255_v33 }
  0xbe   : > { %v303_v34 = vpop.f32.mrf.mxu0 }
  0xbf   : > { %v331_v35 = vpop.f32.mrf.mxu1 }
  0xc0   : > { %v332_v36 = vadd.f32 %v331_v35, %v303_v34 }
  0xc3   : > { %v368_v38 = vpop.f32.mrf.mxu2 }
  0xc4   : > { %v374_v39 = vadd.f32 %v368_v38, %v332_v36 }
  0xc6   : > { %v380_v40 = vadd.f32 %v654_v37, %v374_v39  ;;  %v306_v41 = vpop.f32.mrf.mxu3 }
  0xc7   : > { %v334_v42 = vpop.f32.mrf.mxu1 }
  0xc8   : > { %382 = vst [vmem:[%s238_s5] sm:$0xff] %v380_v40  ;;  %v335_v43 = vadd.f32 %v334_v42, %v306_v41  ;;  %v391_v47 = vmul.f32 %v380_v40, %v380_v40 }
  0xcb   : > { %v371_v44 = vpop.f32.mrf.mxu2 }
  0xcc   : > { %v375_v45 = vadd.f32 %v371_v44, %v335_v43 }
  0xce   : > { %v381_v46 = vadd.f32 %v654_v37, %v375_v45 }
  0xd0   : > { %383 = vst [vmem:[%s238_s5 + $0x8] sm:$0xff] %v381_v46  ;;  %v384_v48 = vadd.f32 %v381_v46, %v380_v40  ;;  %v392_v49 = vmul.f32 %v381_v46, %v381_v46 }
  0xd1   : > { %742 = shalt.err (!%p739_p10)
}
  0xd2   : > { %s822_s26 = smov 128   ;;  %s823_s30 = smov 8   ;;  %v385_v50 = vrot.slane %v384_v48, 4  ;;  %v393_v51 = vadd.f32 %v392_v49, %v391_v47 }
  0xd3   : > { %594 = dma.vmem_to_hbm [thread:$0]  (%p918_p3), %s421_s28, 256, %s423_s11, %s403_s13, %s822_s26, %s822_s26, %s823_s30  }
  0xd4   : > { %v386_v52 = vadd.f32 %v385_v50, %v384_v48  ;;  %v394_v53 = vrot.slane %v393_v51, 4  ;;  %s564_s5 = sshll.u32 %s948_s10, 1  ;;  %s575_s23 = sshll.u32 %s870_s19, 1 }
  0xd5   : > { %s435_s12 = scalar_lea.hbm %s1035_s4, %s575_s23  ;;  %s245_s28 = scalar_lea.vmem [#allocation8], %s564_s5 }
  0xd6   : > { %v387_v54 = vrot.slane %v386_v52, 2  ;;  %v395_v55 = vadd.f32 %v394_v53, %v393_v51  ;;  %s437_s11 = sshll.u32 %s245_s28, 4  ;;  %s439_s13 = sshll.u32 %s435_s12, 4  ;;  %s438_s11 = int_to_ptr.vmem [resolvable:$true] %s437_s11  ;;  %s440_s13 = int_to_ptr.hbm [resolvable:$true] %s439_s13 }
  0xd7   : > { %s408_s19 = scalar_lea.sflag [#allocation9], %s948_s10  ;;  %s757_s14 = sshra.s32 %s440_s13, 4  ;;  %s758_s14 = int_to_ptr.hbm [resolvable:$true] %s757_s14 }
  0xd8   : > { %v388_v56 = vadd.f32 %v387_v54, %v386_v52  ;;  %v396_v57 = vrot.slane %v395_v55, 2  ;;  %s759_s20 = scalar_lea.hbm %s758_s14, 2  ;;  %s763_s7 = scalar_lea.hbm %s1035_s4, 4 }
  0xd9   : > { %p760_p12 = scmp.ne.s32.totalorder %s758_s14, %s759_s20  ;;  %p764_p5 = scmp.lt.s32.totalorder %s758_s14, %s1035_s4 }
  0xda   : > { %v389_v58 = vrot.slane %v388_v56, 1  ;;  %v397_v59 = vadd.f32 %v396_v57, %v395_v55  ;;  %p765_p7 = scmp.lt.s32.totalorder %s763_s7, %s759_s20 }
  0xdb   : > { %p761_p13 = pnand %p760_p12, %p918_p3 }
  0xdc   : > { %v398_v60 = vrot.slane %v397_v59, 1  ;;  %v390_v61 = vadd.f32 %v389_v58, %v388_v56  ;;  %p766_p1 = por %p765_p7, %p764_p5 }
  0xdd   : > { %p762_p0 = pneg %p761_p13 }
  0xde   : > { %v399_v62 = vadd.f32 %v398_v60, %v397_v59 }
  0xdf   : > { %p767_p4 = pnand %p766_p1, %p762_p0 }
  0xe0   : > { %v400_v63 = vsel %vm252_vm1, %v390_v61, %v399_v62 }
  0xe1   : > { %401 = vst [vmem:[%s245_s28] sm:$0x3] %v400_v63 }
  0xe2   : > { %770 = shalt.err (!%p767_p4)
}
  0xe3   : > { %595 = dma.vmem_to_hbm [thread:$0]  (%p918_p3), %s438_s11, 32, %s440_s13, %s408_s19  }
  0xe4 PF: > { %s451_s10 = sand.u32 1, %s805_s15   ;;  %p1041_p8 = scmp.ge.s32.totalorder %s817_s18, 2 }
  0xe5   : > { %s452_s30 = scalar_lea.sflag [#allocation4], %s451_s10 }
  0xe6   : > { %p607_p11 = pnand %p1041_p8, %p884_p6 }
  0xe8   : > { %p608_p9 = pneg %p607_p11 }
  0xea   : > { %796 = dma.done.wait (%p608_p9), %s452_s30, 256  }
  0xeb   : > { %798 = vsyncadd (%p608_p9), %s452_s30, 4294967040  ;;  %s462_s5 = scalar_lea.sflag [#allocation9], %s451_s10 }
  0xec   : > { %800 = dma.done.wait (%p608_p9), %s462_s5, 32  }
  0xed   : > { %802 = vsyncadd (%p608_p9), %s462_s5, 4294967264  ;;  %p22_p3 = scmp.ge.s32.totalorder %s902_s29, 4   ;;  %s1042_s15 = smov %s809_s16 }
  0xee   : > { %s1043_s16 = smov %s813_s17  ;;  %s1044_s17 = smov %s914_s8 }
  0xef   : > { %s1045_s18 = smov %s902_s29  ;;  %24 = sbr.rel (!%p22_p3) target bundleno = 8 (0x8), region = 100 }
  0xf4   :  { %468 = vsyncpa [#allocation3], 1 }
  0xf5   :  { %470 = vsyncpa [#allocation3 + $0x1], 1 }
  0xf6   :  { %471 = vsyncpa [#allocation6], 1 }
  0xf7   :  { %472 = vsyncpa [#allocation4], 1 }
  0xf8   :  { %474 = vsyncpa [#allocation4 + $0x1], 1 }
  0xf9   :  { %475 = vsyncpa [#allocation9], 1 }
  0xfa   :  { %477 = vsyncpa [#allocation9 + $0x1], 1 }

</bundles_post_ra>
